<compile_context>
chip_gen: v6e
topology: v6e:2x2x1
jax: 0.10.0
libtpu: 0.0.40
codegen_flags: <defaults>
</compile_context>

<pallas_src>
import math
import functools

import jax
import jax.numpy as jnp
from jax.experimental import pallas as pl
from jax.experimental.pallas import tpu as pltpu


def _round_up(x, m):
    return ((x + m - 1) // m) * m


def _make_kernel(n_layers, tile_n, chunk):
    """Kernel body for a fixed (static) number of linear layers.

    Refs: xT (in_dim, tile_n) f32, then [Wt_i (fan_out, fan_in) bf16,
    b_i (fan_out, 1) f32] per layer, then out (out_dim, tile_n) f32.
    """
    n_chunks = tile_n // chunk

    def kernel(*refs):
        x_ref = refs[0]
        param_refs = refs[1:1 + 2 * n_layers]
        o_ref = refs[1 + 2 * n_layers]

        # Tiny weights/biases: load once per grid step (hoisted out of the
        # lane-chunk loop).
        wts = [param_refs[2 * i][...] for i in range(n_layers)]       # bf16
        bss = [param_refs[2 * i + 1][...] for i in range(n_layers)]   # f32 (fan_out, 1)

        def body(c, carry):
            start = pl.multiple_of(c * chunk, chunk)
            # bf16 operands into the MXU, f32 accumulation.
            h = x_ref[:, pl.ds(start, chunk)].astype(jnp.bfloat16)
            for i in range(n_layers):
                acc = jnp.dot(wts[i], h, preferred_element_type=jnp.float32)
                acc = acc + bss[i]                       # f32 bias, lane broadcast
                if i < n_layers - 1:
                    acc = jnp.maximum(acc, 0.0)          # ReLU on hidden layers
                    h = acc.astype(jnp.bfloat16)
                else:
                    h = acc
            o_ref[:, pl.ds(start, chunk)] = h.astype(o_ref.dtype)
            return carry

        if n_chunks == 1:
            body(0, 0)
        else:
            # fori_loop (not a Python for) bounds the live ranges per chunk.
            jax.lax.fori_loop(0, n_chunks, body, 0, unroll=True)

    return kernel


def _pick_tile(n, tile_n):
    """Lane-dense batch tile: multiple of 128, amortizes per-step overhead,
    and (when the batch allows) yields >= 2 grid blocks for v7x megacore."""
    n128 = _round_up(max(n, 1), 128)
    tile = max(128, min(tile_n, n128))
    # v7x has 2 TensorCores: prefer >= 2 parallel grid blocks if possible.
    if _round_up(n128, tile) // tile < 2 and n128 >= 256:
        tile = max(128, _round_up((n128 + 1) // 2, 128))
    return tile


def _pick_chunk(tile):
    """Largest lane-chunk <= 512 that divides the tile (tile is a mult of 128)."""
    for c in (512, 256, 128):
        if tile % c == 0:
            return c
    return 128


def pinn_forward_fm(xt, params, *, tile_n=4096):
    """Feature-major fused PINN forward.

    xt:     (in_dim, N) float32   (features on sublanes, batch on lanes)
    params: list of (W, b) with W shaped (fan_in, fan_out), b shaped (fan_out,)
    returns (out_dim, N) float32
    """
    in_dim, n = xt.shape
    out_dim = params[-1][0].shape[1]
    n_layers = len(params)

    tile = _pick_tile(n, tile_n)
    chunk = _pick_chunk(tile)
    n_pad = _round_up(n, tile)

    # Single fused pad along the lane axis (no zeros().at[].set() extra pass).
    if n_pad != n:
        xt = jnp.pad(xt, ((0, 0), (0, n_pad - n)))
    xt = xt.astype(jnp.float32)

    kernel = _make_kernel(n_layers, tile, chunk)

    in_specs = [pl.BlockSpec((in_dim, tile), lambda i: (0, i))]
    flat_params = []
    param_bytes = 0
    flops = 0
    for w, b in params:
        wt = jnp.asarray(w).T.astype(jnp.bfloat16)          # (fan_out, fan_in) bf16
        bt = jnp.asarray(b, jnp.float32).reshape(-1, 1)     # (fan_out, 1) f32
        in_specs.append(pl.BlockSpec(wt.shape, lambda i: (0, 0)))
        in_specs.append(pl.BlockSpec(bt.shape, lambda i: (0, 0)))
        flat_params.extend([wt, bt])
        param_bytes += wt.size * 2 + bt.size * 4
        flops += 2 * wt.shape[0] * wt.shape[1] * n_pad

    out_spec = pl.BlockSpec((out_dim, tile), lambda i: (0, i))

    cost = pl.CostEstimate(
        flops=flops,
        transcendentals=0,
        bytes_accessed=(in_dim + out_dim) * n_pad * 4 + param_bytes,
    )

    # VMEM budget (double-buffered IO blocks + params + chunked intermediates);
    # only raise the scoped limit if it would actually exceed the default.
    layer_size = max(w.shape[1] for w, _ in params)
    vmem_need = (4 * (in_dim + out_dim) * tile * 4
                 + 4 * param_bytes
                 + 8 * layer_size * chunk * 4)
    compiler_kwargs = dict(dimension_semantics=("parallel",))
    if vmem_need > (32 << 20):
        # Cap at 64 MiB so the same tile choice stays safe on v7x (64 MiB/TC).
        compiler_kwargs["vmem_limit_bytes"] = min(vmem_need * 2, 64 << 20)

    yt = pl.pallas_call(
        kernel,
        out_shape=jax.ShapeDtypeStruct((out_dim, n_pad), jnp.float32),
        grid_spec=pltpu.PrefetchScalarGridSpec(
            num_scalar_prefetch=0,
            grid=(n_pad // tile,),
            in_specs=in_specs,
            out_specs=out_spec,
        ),
        compiler_params=pltpu.CompilerParams(**compiler_kwargs),
        cost_estimate=cost,
    )(xt, *flat_params)

    return yt[:, :n]


def pinn_forward(x, params, *, tile_n=4096):
    """Batch-major convenience wrapper matching the PyTorch module layout.

    x: (N, in_dim) float32  ->  (N, out_dim) float32
    Prefer pinn_forward_fm if the caller can produce feature-major data
    directly (drops the transpose passes over HBM).
    """
    return pinn_forward_fm(x.T, params, tile_n=tile_n).T


def init_pinn_params(key, in_dim, out_dim, layer_size, layer_count):
    """Deterministic init mirroring nn.Linear default U(-1/sqrt(fan_in), ...).

    Layer structure (matches the PyTorch module):
      Linear(in_dim, layer_size) + ReLU
      layer_count x [Linear(layer_size, layer_size) + ReLU]
      Linear(layer_size, out_dim)            (self.out, no ReLU)
    """
    dims = [(in_dim, layer_size)]
    dims += [(layer_size, layer_size)] * layer_count
    dims += [(layer_size, out_dim)]

    params = []
    for fan_in, fan_out in dims:
        key, kw, kb = jax.random.split(key, 3)
        bound = 1.0 / math.sqrt(fan_in)
        w = jax.random.uniform(kw, (fan_in, fan_out), jnp.float32, -bound, bound)
        b = jax.random.uniform(kb, (fan_out,), jnp.float32, -bound, bound)
        params.append((w, b))
    return params


def pinn_forward_ref_f32(x, params):
    """Plain-JAX f32 reference."""
    h = x
    for i, (w, b) in enumerate(params):
        h = h @ w + b[None, :]
        if i < len(params) - 1:
            h = jnp.maximum(h, 0.0)
    return h


def pinn_forward_ref_mixed(x, params):
    """Plain-JAX reference with the same bf16-operand / f32-accumulate math."""
    h = x.astype(jnp.bfloat16)
    for i, (w, b) in enumerate(params):
        y = jnp.dot(h, w.astype(jnp.bfloat16),
                    preferred_element_type=jnp.float32) + b[None, :]
        if i < len(params) - 1:
            y = jnp.maximum(y, 0.0)
            h = y.astype(jnp.bfloat16)
        else:
            h = y
    return h


if __name__ == "__main__":
    # PINN(in_dim=4, out_dim=2, layer_size=32, layer_count=2)
    in_dim, out_dim, layer_size, layer_count = 4, 2, 32, 2

    key = jax.random.PRNGKey(0)
    params = init_pinn_params(key, in_dim, out_dim, layer_size, layer_count)

    ok = True
    for batch in (16, 300):   # small single-block case and multi-block case
        key, kx = jax.random.split(key)
        x = jax.random.normal(kx, (batch, in_dim), jnp.float32)

        out = pinn_forward(x, params)
        out = jax.block_until_ready(out)
        assert out.shape == (batch, out_dim)

        ref_mixed = pinn_forward_ref_mixed(x, params)
        ref_f32 = pinn_forward_ref_f32(x, params)
        # Tight vs. the identical mixed-precision math, loose vs. pure f32
        # (bf16 MXU operands introduce ~1e-3..1e-2 relative error).
        ok &= bool(jnp.allclose(out, ref_mixed, atol=1e-3, rtol=1e-3))
        ok &= bool(jnp.allclose(out, ref_f32, atol=5e-2, rtol=5e-2))

    assert ok, "Pallas output mismatch vs reference"
    print("KERNEL_OK")
</pallas_src>

<mosaic_0001>
module attributes {stable_mosaic.version = 11 : i64} {
  func.func @kernel(%arg0: i32, %arg1: memref<4x128xf32, #tpu.memory_space<vmem>>, %arg2: memref<32x4xbf16, #tpu.memory_space<vmem>>, %arg3: memref<32x1xf32, #tpu.memory_space<vmem>>, %arg4: memref<32x32xbf16, #tpu.memory_space<vmem>>, %arg5: memref<32x1xf32, #tpu.memory_space<vmem>>, %arg6: memref<32x32xbf16, #tpu.memory_space<vmem>>, %arg7: memref<32x1xf32, #tpu.memory_space<vmem>>, %arg8: memref<2x32xbf16, #tpu.memory_space<vmem>>, %arg9: memref<2x1xf32, #tpu.memory_space<vmem>>, %arg10: memref<2x128xf32, #tpu.memory_space<vmem>>) attributes {dimension_semantics = [#tpu.dimension_semantics<parallel>], iteration_bounds = array<i64: 1>, scalar_prefetch = 0 : i64, scratch_operands = 0 : i64, tpu.core_type = #tpu.core_type<tc>, window_params = [{transform_indices = @transform_0, window_bounds = array<i64: 4, 128>}, {pipeline_mode = #tpu.pipeline_mode<synchronous>, transform_indices = @transform_1, window_bounds = array<i64: 32, 4>}, {pipeline_mode = #tpu.pipeline_mode<synchronous>, transform_indices = @transform_2, window_bounds = array<i64: 32, 1>}, {pipeline_mode = #tpu.pipeline_mode<synchronous>, transform_indices = @transform_3, window_bounds = array<i64: 32, 32>}, {pipeline_mode = #tpu.pipeline_mode<synchronous>, transform_indices = @transform_4, window_bounds = array<i64: 32, 1>}, {pipeline_mode = #tpu.pipeline_mode<synchronous>, transform_indices = @transform_5, window_bounds = array<i64: 32, 32>}, {pipeline_mode = #tpu.pipeline_mode<synchronous>, transform_indices = @transform_6, window_bounds = array<i64: 32, 1>}, {pipeline_mode = #tpu.pipeline_mode<synchronous>, transform_indices = @transform_7, window_bounds = array<i64: 2, 32>}, {pipeline_mode = #tpu.pipeline_mode<synchronous>, transform_indices = @transform_8, window_bounds = array<i64: 2, 1>}, {transform_indices = @transform_9, window_bounds = array<i64: 2, 128>}]} {
    %c0 = arith.constant 0 : index
    %c0_0 = arith.constant 0 : index
    %0 = vector.load %arg2[%c0, %c0_0] : memref<32x4xbf16, #tpu.memory_space<vmem>>, vector<32x4xbf16>
    %c0_1 = arith.constant 0 : index
    %c0_2 = arith.constant 0 : index
    %1 = vector.load %arg4[%c0_1, %c0_2] : memref<32x32xbf16, #tpu.memory_space<vmem>>, vector<32x32xbf16>
    %c0_3 = arith.constant 0 : index
    %c0_4 = arith.constant 0 : index
    %2 = vector.load %arg6[%c0_3, %c0_4] : memref<32x32xbf16, #tpu.memory_space<vmem>>, vector<32x32xbf16>
    %c0_5 = arith.constant 0 : index
    %c0_6 = arith.constant 0 : index
    %3 = vector.load %arg8[%c0_5, %c0_6] : memref<2x32xbf16, #tpu.memory_space<vmem>>, vector<2x32xbf16>
    %c0_7 = arith.constant 0 : index
    %c0_8 = arith.constant 0 : index
    %4 = vector.load %arg3[%c0_7, %c0_8] : memref<32x1xf32, #tpu.memory_space<vmem>>, vector<32x1xf32>
    %c0_9 = arith.constant 0 : index
    %c0_10 = arith.constant 0 : index
    %5 = vector.load %arg5[%c0_9, %c0_10] : memref<32x1xf32, #tpu.memory_space<vmem>>, vector<32x1xf32>
    %c0_11 = arith.constant 0 : index
    %c0_12 = arith.constant 0 : index
    %6 = vector.load %arg7[%c0_11, %c0_12] : memref<32x1xf32, #tpu.memory_space<vmem>>, vector<32x1xf32>
    %c0_13 = arith.constant 0 : index
    %c0_14 = arith.constant 0 : index
    %7 = vector.load %arg9[%c0_13, %c0_14] : memref<2x1xf32, #tpu.memory_space<vmem>>, vector<2x1xf32>
    %c0_i32 = arith.constant 0 : i32
    %8 = tpu.assume_multiple %c0_i32, 128 : i32
    %c0_15 = arith.constant 0 : index
    %9 = arith.index_cast %8 : i32 to index
    %10 = vector.load %arg1[%c0_15, %9] : memref<4x128xf32, #tpu.memory_space<vmem>>, vector<4x128xf32>
    %11 = arith.truncf %10 : vector<4x128xf32> to vector<4x128xbf16>
    %cst = arith.constant dense<0.000000e+00> : vector<32x128xf32>
    %12 = tpu.matmul %0, %11, %cst {dimension_numbers = #tpu.dot_dimension_numbers<[1], [0], [0], [1], [0, 0, 1, 1], [], []>} : vector<32x4xbf16>, vector<4x128xbf16>, vector<32x128xf32> -> vector<32x128xf32>
    %13 = vector.broadcast %4 : vector<32x1xf32> to vector<32x128xf32>
    %14 = arith.addf %12, %13 : vector<32x128xf32>
    %cst_16 = arith.constant 0.000000e+00 : f32
    %15 = vector.broadcast %cst_16 : f32 to vector<32x128xf32>
    %16 = arith.maximumf %14, %15 : vector<32x128xf32>
    %17 = arith.truncf %16 : vector<32x128xf32> to vector<32x128xbf16>
    %cst_17 = arith.constant dense<0.000000e+00> : vector<32x128xf32>
    %18 = tpu.matmul %1, %17, %cst_17 {dimension_numbers = #tpu.dot_dimension_numbers<[1], [0], [0], [1], [0, 0, 1, 1], [], []>} : vector<32x32xbf16>, vector<32x128xbf16>, vector<32x128xf32> -> vector<32x128xf32>
    %19 = vector.broadcast %5 : vector<32x1xf32> to vector<32x128xf32>
    %20 = arith.addf %18, %19 : vector<32x128xf32>
    %cst_18 = arith.constant 0.000000e+00 : f32
    %21 = vector.broadcast %cst_18 : f32 to vector<32x128xf32>
    %22 = arith.maximumf %20, %21 : vector<32x128xf32>
    %23 = arith.truncf %22 : vector<32x128xf32> to vector<32x128xbf16>
    %cst_19 = arith.constant dense<0.000000e+00> : vector<32x128xf32>
    %24 = tpu.matmul %2, %23, %cst_19 {dimension_numbers = #tpu.dot_dimension_numbers<[1], [0], [0], [1], [0, 0, 1, 1], [], []>} : vector<32x32xbf16>, vector<32x128xbf16>, vector<32x128xf32> -> vector<32x128xf32>
    %25 = vector.broadcast %6 : vector<32x1xf32> to vector<32x128xf32>
    %26 = arith.addf %24, %25 : vector<32x128xf32>
    %cst_20 = arith.constant 0.000000e+00 : f32
    %27 = vector.broadcast %cst_20 : f32 to vector<32x128xf32>
    %28 = arith.maximumf %26, %27 : vector<32x128xf32>
    %29 = arith.truncf %28 : vector<32x128xf32> to vector<32x128xbf16>
    %cst_21 = arith.constant dense<0.000000e+00> : vector<2x128xf32>
    %30 = tpu.matmul %3, %29, %cst_21 {dimension_numbers = #tpu.dot_dimension_numbers<[1], [0], [0], [1], [0, 0, 1, 1], [], []>} : vector<2x32xbf16>, vector<32x128xbf16>, vector<2x128xf32> -> vector<2x128xf32>
    %31 = vector.broadcast %7 : vector<2x1xf32> to vector<2x128xf32>
    %32 = arith.addf %30, %31 : vector<2x128xf32>
    %c0_22 = arith.constant 0 : index
    %33 = arith.index_cast %8 : i32 to index
    %34 = vector.load %arg10[%c0_22, %33] : memref<2x128xf32, #tpu.memory_space<vmem>>, vector<2x128xf32>
    tpu.vector_store %arg10[%c0_22, %33], %32 {strides = array<i32>} : memref<2x128xf32, #tpu.memory_space<vmem>>, vector<2x128xf32>,
    return
  }
  func.func @transform_0(%arg0: i32) -> (i32, i32) {
    %c0_i32 = arith.constant 0 : i32
    %c0_i32_0 = arith.constant 0 : i32
    return %c0_i32, %arg0 : i32, i32
  }
  func.func @transform_1(%arg0: i32) -> (i32, i32) {
    %c0_i32 = arith.constant 0 : i32
    %c0_i32_0 = arith.constant 0 : i32
    %c0_i32_1 = arith.constant 0 : i32
    return %c0_i32, %c0_i32_0 : i32, i32
  }
  func.func @transform_2(%arg0: i32) -> (i32, i32) {
    %c0_i32 = arith.constant 0 : i32
    %c0_i32_0 = arith.constant 0 : i32
    %c0_i32_1 = arith.constant 0 : i32
    return %c0_i32, %c0_i32_0 : i32, i32
  }
  func.func @transform_3(%arg0: i32) -> (i32, i32) {
    %c0_i32 = arith.constant 0 : i32
    %c0_i32_0 = arith.constant 0 : i32
    %c0_i32_1 = arith.constant 0 : i32
    return %c0_i32, %c0_i32_0 : i32, i32
  }
  func.func @transform_4(%arg0: i32) -> (i32, i32) {
    %c0_i32 = arith.constant 0 : i32
    %c0_i32_0 = arith.constant 0 : i32
    %c0_i32_1 = arith.constant 0 : i32
    return %c0_i32, %c0_i32_0 : i32, i32
  }
  func.func @transform_5(%arg0: i32) -> (i32, i32) {
    %c0_i32 = arith.constant 0 : i32
    %c0_i32_0 = arith.constant 0 : i32
    %c0_i32_1 = arith.constant 0 : i32
    return %c0_i32, %c0_i32_0 : i32, i32
  }
  func.func @transform_6(%arg0: i32) -> (i32, i32) {
    %c0_i32 = arith.constant 0 : i32
    %c0_i32_0 = arith.constant 0 : i32
    %c0_i32_1 = arith.constant 0 : i32
    return %c0_i32, %c0_i32_0 : i32, i32
  }
  func.func @transform_7(%arg0: i32) -> (i32, i32) {
    %c0_i32 = arith.constant 0 : i32
    %c0_i32_0 = arith.constant 0 : i32
    %c0_i32_1 = arith.constant 0 : i32
    return %c0_i32, %c0_i32_0 : i32, i32
  }
  func.func @transform_8(%arg0: i32) -> (i32, i32) {
    %c0_i32 = arith.constant 0 : i32
    %c0_i32_0 = arith.constant 0 : i32
    %c0_i32_1 = arith.constant 0 : i32
    return %c0_i32, %c0_i32_0 : i32, i32
  }
  func.func @transform_9(%arg0: i32) -> (i32, i32) {
    %c0_i32 = arith.constant 0 : i32
    %c0_i32_0 = arith.constant 0 : i32
    return %c0_i32, %arg0 : i32, i32
  }
}

</mosaic_0001>

<bundles_post_ra>
// kernel: tpu_custom_call.1
= control target key start
LH: loop header
LB: loop body
LE: loop exit
PB: predicated region body
PF: predicated region fallthrough
CT: control target
= control target key end

     0   :  { %vm99_vm0 = vcmask 1041408   ;;  %vm92_vm1 = vcmask 31744   ;;  %v496_v6 = vmov 0   ;;  %s621_s0 = inlined_call_operand.vmem [shape: f32[4,128], index: 0, kind: input, shape index: {}]   ;;  %s622_s1 = inlined_call_operand.vmem [shape: bf16[32,4], index: 1, kind: input, shape index: {}]   ;;  %s623_s2 = inlined_call_operand.vmem [shape: f32[32,1], index: 2, kind: input, shape index: {}]   ;;  %s624_s3 = inlined_call_operand.vmem [shape: bf16[32,32], index: 3, kind: input, shape index: {}]   ;;  %s625_s4 = inlined_call_operand.vmem [shape: f32[32,1], index: 4, kind: input, shape index: {}]   ;;  %s626_s5 = inlined_call_operand.vmem [shape: bf16[32,32], index: 5, kind: input, shape index: {}]   ;;  %s627_s6 = inlined_call_operand.vmem [shape: f32[32,1], index: 6, kind: input, shape index: {}]   ;;  %s628_s7 = inlined_call_operand.vmem [shape: bf16[2,32], index: 7, kind: input, shape index: {}]   ;;  %s629_s8 = inlined_call_operand.vmem [shape: f32[2,1], index: 8, kind: input, shape index: {}]   ;;  %s630_s9 = inlined_call_operand.hbm [shape: f32[2,128], index: 9, kind: output, shape index: {}]  }
   0x1   :  { %v60_v0 = vld [vmem:[%s621_s0] sm:$0xf]  ;;  %v49_v3 = vld [vmem:[%s623_s2 + $0x10] sm:$0xff]  ;;  %v469_v5 = vld [vmem:[%s622_s1 + $0x8] sm:$0xff]   ;;  %466 = vset.pattern.permute.xlu0 %v496_v6  ;;  %467 = vset.pattern.permute.xlu1 %v496_v6 }
   0x2   :  { %v468_v1 = vld [vmem:[%s622_s1] sm:$0xff]   ;;  %v61_v2 = vpack.c.bf16 %v60_v0, %v60_v0  ;;  %74 = vperm.xlu0 %466, %v49_v3   ;;  %v50_v8 = vld [vmem:[%s623_s2 + $0x18] sm:$0xff]  ;;  %v48_v9 = vld [vmem:[%s623_s2 + $0x8] sm:$0xff] }
   0x3   :  { %433 = vmatprep.mubr.msk.bf16.mxu0 %vm92_vm1, %v468_v1  ;;  %v47_v7 = vld [vmem:[%s623_s2] sm:$0xff]  ;;  %v53_v10 = vld [vmem:[%s625_s4 + $0x10] sm:$0xff] }
   0x4   :  { %461 = vmatprep.subr.msk.bf16.mxu0 %vm99_vm0, %v61_v2  ;;  %v101_v4 = vsel %vm99_vm0, %v61_v2, 0  ;;  %64 = vperm.xlu1 %467, %v47_v7  }
   0x5   :  { %432 = vmatpush3.bf16.msra.mxu0 %v101_v4 }
   0x6   :  { %79 = vperm.xlu0 %466, %v50_v8  }
   0x8   :  { %434 = vmatmul.mubr.msk.bf16.vlgmr.msra.gmra.mxu0 %vm92_vm1, %v469_v5 }
   0x9   :  { %14 = vsyncpa [#allocation3], 0  ;;  %69 = vperm.xlu1 %467, %v48_v9   ;;  %v54_v11 = vld [vmem:[%s625_s4 + $0x18] sm:$0xff]  ;;  %v51_v12 = vld [vmem:[%s625_s4] sm:$0xff]  ;;  %vm188_vm2 = vcmask 261120   ;;  %v497_v59 = vmov 0.0  }
   0xa   :  { %170 = vperm.xlu0 %466, %v53_v10   ;;  %v52_v13 = vld [vmem:[%s625_s4 + $0x8] sm:$0xff]  ;;  %v57_v14 = vld [vmem:[%s627_s6 + $0x10] sm:$0xff]  ;;  %v58_v15 = vld [vmem:[%s627_s6 + $0x18] sm:$0xff]  ;;  %vm498_vm3 = vmmov 0   ;;  %s499_s21 = smov [#allocation2]  }
   0xb   :  { %v55_v16 = vld [vmem:[%s627_s6] sm:$0xff]  ;;  %v56_v17 = vld [vmem:[%s627_s6 + $0x8] sm:$0xff]  ;;  %s396_s1 = sshll.u32 %s499_s21, 4  ;;  %s397_s1 = int_to_ptr.vmem [resolvable:$true] %s396_s1 }
   0xc   :  { %v59_v18 = vld [vmem:[%s629_s8] sm:$0x3]  ;;  %v471_v38 = vld [vmem:[%s624_s3 + $0x8] sm:$0xff]   ;;  %s474_s22 = scalar_lea.vmem %s397_s1, 32  ;;  %p479_p1 = scmp.lt.s32.totalorder %s397_s1, %s397_s1 }
   0xd   :  { %175 = vperm.xlu1 %467, %v54_v11   ;;  %v470_v19 = vld [vmem:[%s624_s3] sm:$0xff]   ;;  %v473_v58 = vld [vmem:[%s626_s5 + $0x8] sm:$0xff]   ;;  %p475_p0 = scmp.ne.s32.totalorder %s397_s1, %s474_s22  ;;  %p480_p2 = scmp.lt.s32.totalorder %s474_s22, %s474_s22 }
   0xe   :  { %160 = vperm.xlu0 %466, %v51_v12   ;;  %441 = vmatprep.mubr.msk.bf16.mxu1 %vm188_vm2, %v470_v19  ;;  %v472_v39 = vld [vmem:[%s626_s5] sm:$0xff]  }
   0xf   :  { %449 = vmatprep.mubr.msk.bf16.mxu0 %vm188_vm2, %v472_v39  ;;  %p481_p3 = por %p480_p2, %p479_p1 }
  0x11   :  { %165 = vperm.xlu1 %467, %v52_v13   ;;  %p482_p4 = pnand %p481_p3, %p475_p0 }
  0x12   :  { %262 = vperm.xlu0 %466, %v57_v14   ;;  %v46_v14 = vld [vmem:[%s628_s7] sm:$0x1] }
  0x15   :  { %267 = vperm.xlu1 %467, %v58_v15  }
  0x16   :  { %252 = vperm.xlu0 %466, %v55_v16  }
  0x19   :  { %257 = vperm.xlu1 %467, %v56_v17  }
  0x1a   :  { %343 = vperm.xlu0 %466, %v59_v18  }
  0x7d   :  { %v75_v20 = vpop.permute.xlu0 %74 }
  0x7f   :  { %v65_v21 = vpop.permute.xlu1 %64 }
  0x81   :  { %v80_v25 = vpop.permute.xlu0 %79 }
  0x84   :  { %v70_v29 = vpop.permute.xlu1 %69 }
  0x85   :  { %v171_v40 = vpop.permute.xlu0 %170 }
  0x88   :  { %v176_v41 = vpop.permute.xlu1 %175 }
  0x89   :  { %v161_v45 = vpop.permute.xlu0 %160 }
  0x8c   :  { %v166_v49 = vpop.permute.xlu1 %165 }
  0x8d   :  { %v263_v60 = vpop.permute.xlu0 %262 }
  0x90   :  { %v268_v61 = vpop.permute.xlu1 %267 }
  0x91   :  { %v253_v2 = vpop.permute.xlu0 %252 }
  0x94   :  { %v258_v4 = vpop.permute.xlu1 %257 }
  0x95   :  { %v344_v15 = vpop.permute.xlu0 %343 }
  0xc8   :  { %v435_v22 = vpop.f32.mrf.mxu0 }
  0xc9   :  { %v146_v24 = vadd.f32 %v435_v22, %v75_v20 }
  0xca   :  { %v137_v23 = vpop.f32.mrf.mxu0 }
  0xcb   :  { %v138_v27 = vadd.f32 %v137_v23, %v65_v21  ;;  %v154_v31 = vmax.f32 %v146_v24, 0.0 }
  0xcc   :  { %v436_v26 = vpop.f32.mrf.mxu0 }
  0xcd   :  { %v149_v28 = vadd.f32 %v436_v26, %v80_v25  ;;  %v152_v34 = vmax.f32 %v138_v27, 0.0 }
  0xce   :  { %v140_v30 = vpop.f32.mrf.mxu0 }
  0xcf   :  { %v155_v32 = vmax.f32 %v149_v28, 0.0  ;;  %v141_v33 = vadd.f32 %v140_v30, %v70_v29 }
  0xd1   :  { %v153_v35 = vmax.f32 %v141_v33, 0.0  ;;  %v157_v36 = vpack.c.bf16 %v155_v32, %v154_v31 }
  0xd3   :  { %v156_v37 = vpack.c.bf16 %v153_v35, %v152_v34  ;;  %437 = vmatprep.subr.bf16.mxu1 %v157_v36 }
  0xd4   :  { %438 = vmatpush3.bf16.msra.mxu1 %v157_v36 }
  0xd5   :  { %439 = vmatprep.subr.bf16.mxu1 %v156_v37 }
  0xd8   :  { %440 = vmatpush3.bf16.msra.mxu1 %v156_v37 }
  0xd9   :  { %453 = vmatprep.subr.bf16.mxu1 %v497_v59 }
  0xdb   :  { %442 = vmatmul.mubr.msk.bf16.vlgmr.msra.gmra.mxu1 %vm188_vm2, %v471_v38 }
  0xdc   :  { %457 = vmatprep.mubr.msk.bf16.mxu1 %vm498_vm3, %v497_v59 }
 0x19b   :  { %v443_v42 = vpop.f32.mrf.mxu1 }
 0x19c   :  { %v238_v44 = vadd.f32 %v443_v42, %v171_v40 }
 0x19d   :  { %v229_v43 = vpop.f32.mrf.mxu1 }
 0x19e   :  { %v230_v47 = vadd.f32 %v229_v43, %v161_v45  ;;  %v246_v51 = vmax.f32 %v238_v44, 0.0 }
 0x19f   :  { %v444_v46 = vpop.f32.mrf.mxu1 }
 0x1a0   :  { %v241_v48 = vadd.f32 %v444_v46, %v176_v41  ;;  %v244_v54 = vmax.f32 %v230_v47, 0.0 }
 0x1a1   :  { %v232_v50 = vpop.f32.mrf.mxu1 }
 0x1a2   :  { %v247_v52 = vmax.f32 %v241_v48, 0.0  ;;  %v233_v53 = vadd.f32 %v232_v50, %v166_v49 }
 0x1a4   :  { %v249_v55 = vpack.c.bf16 %v247_v52, %v246_v51  ;;  %v245_v56 = vmax.f32 %v233_v53, 0.0 }
 0x1a6   :  { %v248_v57 = vpack.c.bf16 %v245_v56, %v244_v54  ;;  %445 = vmatprep.subr.bf16.mxu0 %v249_v55 }
 0x1a7   :  { %446 = vmatpush3.bf16.msra.mxu0 %v249_v55 }
 0x1a8   :  { %447 = vmatprep.subr.bf16.mxu0 %v248_v57 }
 0x1ab   :  { %448 = vmatpush3.bf16.msra.mxu0 %v248_v57 }
 0x1ae   :  { %450 = vmatmul.mubr.msk.bf16.vlgmr.msra.gmra.mxu0 %vm188_vm2, %v473_v58 }
 0x26e   :  { %v451_v62 = vpop.f32.mrf.mxu0 }
 0x26f   :  { %v329_v0 = vadd.f32 %v451_v62, %v263_v60 }
 0x270   :  { %v320_v63 = vpop.f32.mrf.mxu0 }
 0x271   :  { %v337_v6 = vmax.f32 %v329_v0, 0.0  ;;  %v321_v7 = vadd.f32 %v320_v63, %v253_v2 }
 0x272   :  { %v452_v1 = vpop.f32.mrf.mxu0 }
 0x273   :  { %v332_v3 = vadd.f32 %v452_v1, %v268_v61  ;;  %v335_v12 = vmax.f32 %v321_v7, 0.0 }
 0x274   :  { %v323_v5 = vpop.f32.mrf.mxu0 }
 0x275   :  { %v338_v8 = vmax.f32 %v332_v3, 0.0  ;;  %v324_v9 = vadd.f32 %v323_v5, %v258_v4 }
 0x277   :  { %v340_v10 = vpack.c.bf16 %v338_v8, %v337_v6  ;;  %v336_v11 = vmax.f32 %v324_v9, 0.0 }
 0x279   :  { %454 = vmatpush3.bf16.msra.mxu1 %v340_v10  ;;  %v339_v13 = vpack.c.bf16 %v336_v11, %v335_v12 }
 0x27a   :  { %455 = vmatprep.subr.bf16.mxu1 %v497_v59 }
 0x27d   :  { %456 = vmatpush3.bf16.msra.mxu1 %v339_v13 }
 0x280   :  { %458 = vmatmul.mubr.msk.bf16.vlgmr.msra.gmra.mxu1 %vm188_vm2, %v46_v14 }
 0x340   :  { %v383_v16 = vpop.f32.mrf.mxu1 }
 0x341   :  { %v384_v17 = vadd.f32 %v383_v16, %v344_v15 }
 0x342   :  { %v459_v18 = vpop.f32.mrf.mxu1 }
 0x343   :  { %389 = vst [vmem:[#allocation2] sm:$0x3] %v384_v17 }
 0x344   :  { %v386_v19 = vpop.f32.mrf.mxu1 }
 0x345   :  { %485 = shalt.err (!%p482_p4)
}
 0x346   :  { %399 = dma.vmem_to_hbm [thread:$0]  %s397_s1, 32, %s630_s9, [#allocation3]   ;;  %v460_v20 = vpop.f32.mrf.mxu1 }
 0x347   :  { %494 = dma.done.wait [#allocation3], 32  }
 0x348   :  { %495 = vsyncadd [#allocation3], 4294967264 }
 0x349   :  { %403 = vsyncpa [#allocation3], 1 }

</bundles_post_ra>
